<compile_context>
chip_gen: v7x
topology: tpu7x:2x2x1
jax: 0.10.0
libtpu: 0.0.40
codegen_flags: <defaults>
</compile_context>

<pallas_src>
import jax
import jax.numpy as jnp
from jax.experimental import pallas as pl
from jax.experimental.pallas import tpu as pltpu

K_IN = 5        # true input features
K_PAD = 8       # padded contraction dim for layer 1
H = 256         # hidden width
N_OUT = 366     # true output features
N_PAD = 384     # lane-dense padded output width (3 x 128)


def mlp_kernel(x_ref, w1_ref, b1_ref, w2_ref, b2_ref, w3_ref, b3_ref, o_ref):
    # Layer 1: (TM, 8) @ (8, 256) + (1, 256) -> ReLU
    h1 = jnp.dot(x_ref[...], w1_ref[...], preferred_element_type=jnp.float32)
    h1 = jnp.maximum(h1 + b1_ref[...], 0.0)
    # Layer 2: (TM, 256) @ (256, 256) + (1, 256) -> ReLU
    h2 = jnp.dot(h1, w2_ref[...], preferred_element_type=jnp.float32)
    h2 = jnp.maximum(h2 + b2_ref[...], 0.0)
    # Layer 3: (TM, 256) @ (256, 384) + (1, 384)  (no activation, lane-dense store)
    h3 = jnp.dot(h2, w3_ref[...], preferred_element_type=jnp.float32)
    o_ref[...] = (h3 + b3_ref[...]).astype(o_ref.dtype)


def _round_up(n, m):
    return ((n + m - 1) // m) * m


def teste_forward(x, params, *, tm=256):
    """x: (B, 5) float32; params: dict of (w1,b1,w2,b2,w3,b3) stored as (in,out)."""
    B = x.shape[0]

    # Pad K: 5 -> 8 (zero columns/rows, exact math preserved).
    x_p = jnp.pad(x, ((0, 0), (0, K_PAD - K_IN)))
    w1_p = jnp.pad(params["w1"], ((0, K_PAD - K_IN), (0, 0)))
    # Pad N: 366 -> 384 with zero weight columns / zero bias lanes.
    w3_p = jnp.pad(params["w3"], ((0, 0), (0, N_PAD - N_OUT)))
    b3_p = jnp.pad(params["b3"], ((0, 0), (0, N_PAD - N_OUT)))

    # Batch tiling: for small B use a single (8-aligned) tile; otherwise tile at tm.
    tm_eff = min(tm, _round_up(B, 8))
    b_pad = _round_up(B, tm_eff)
    if b_pad != B:
        x_p = jnp.pad(x_p, ((0, b_pad - B), (0, 0)))

    grid = (b_pad // tm_eff,)

    out = pl.pallas_call(
        mlp_kernel,
        out_shape=jax.ShapeDtypeStruct((b_pad, N_PAD), jnp.float32),
        grid=grid,
        in_specs=[
            pl.BlockSpec((tm_eff, K_PAD), lambda i: (i, 0)),   # x    (tiled over batch)
            pl.BlockSpec((K_PAD, H), lambda i: (0, 0)),        # w1   (resident)
            pl.BlockSpec((1, H), lambda i: (0, 0)),            # b1   (resident)
            pl.BlockSpec((H, H), lambda i: (0, 0)),            # w2   (resident)
            pl.BlockSpec((1, H), lambda i: (0, 0)),            # b2   (resident)
            pl.BlockSpec((H, N_PAD), lambda i: (0, 0)),        # w3   (resident)
            pl.BlockSpec((1, N_PAD), lambda i: (0, 0)),        # b3   (resident)
        ],
        out_specs=pl.BlockSpec((tm_eff, N_PAD), lambda i: (i, 0)),
        compiler_params=pltpu.CompilerParams(
            dimension_semantics=("parallel",),
        ),
    )(x_p, w1_p, params["b1"], params["w2"], params["b2"], w3_p, b3_p)

    # Slice back to the true (B, 366) result.
    return out[:B, :N_OUT]


def init_params(key):
    """Deterministic init mimicking torch.nn.Linear default U[-1/sqrt(fan_in), +1/sqrt(fan_in)]."""
    def linear_init(k, fan_in, fan_out):
        kw, kb = jax.random.split(k)
        bound = 1.0 / jnp.sqrt(fan_in)
        # stored as (in, out) so the kernel does x @ W
        w = jax.random.uniform(kw, (fan_in, fan_out), jnp.float32, -bound, bound)
        b = jax.random.uniform(kb, (1, fan_out), jnp.float32, -bound, bound)
        return w, b

    k1, k2, k3 = jax.random.split(key, 3)
    w1, b1 = linear_init(k1, K_IN, H)
    w2, b2 = linear_init(k2, H, H)
    w3, b3 = linear_init(k3, H, N_OUT)
    return {"w1": w1, "b1": b1, "w2": w2, "b2": b2, "w3": w3, "b3": b3}


def teste_reference(x, p):
    h1 = jnp.maximum(x @ p["w1"] + p["b1"], 0.0)
    h2 = jnp.maximum(h1 @ p["w2"] + p["b2"], 0.0)
    return h2 @ p["w3"] + p["b3"]


if __name__ == "__main__":
    key = jax.random.PRNGKey(0)
    kx, kp = jax.random.split(key)

    B = 8
    x = jax.random.normal(kx, (B, K_IN), jnp.float32)
    params = init_params(kp)

    out = teste_forward(x, params)
    out = jax.block_until_ready(out)

    ref = teste_reference(x, params)
    assert out.shape == (B, N_OUT), out.shape
    assert jnp.allclose(out, ref, atol=1e-4, rtol=1e-4), "mismatch vs reference"

    print("KERNEL_OK")
</pallas_src>

<mosaic_0001>
module attributes {stable_mosaic.version = 11 : i64} {
  func.func @mlp_kernel(%arg0: i32, %arg1: memref<8x8xf32, #tpu.memory_space<vmem>>, %arg2: memref<8x256xf32, #tpu.memory_space<vmem>>, %arg3: memref<1x256xf32, #tpu.memory_space<vmem>>, %arg4: memref<256x256xf32, #tpu.memory_space<vmem>>, %arg5: memref<1x256xf32, #tpu.memory_space<vmem>>, %arg6: memref<256x384xf32, #tpu.memory_space<vmem>>, %arg7: memref<1x384xf32, #tpu.memory_space<vmem>>, %arg8: memref<8x384xf32, #tpu.memory_space<vmem>>) attributes {dimension_semantics = [#tpu.dimension_semantics<parallel>], iteration_bounds = array<i64: 1>, scalar_prefetch = 0 : i64, scratch_operands = 0 : i64, tpu.core_type = #tpu.core_type<tc>, window_params = [{transform_indices = @transform_0, window_bounds = array<i64: 8, 8>}, {pipeline_mode = #tpu.pipeline_mode<synchronous>, transform_indices = @transform_1, window_bounds = array<i64: 8, 256>}, {pipeline_mode = #tpu.pipeline_mode<synchronous>, transform_indices = @transform_2, window_bounds = array<i64: 1, 256>}, {pipeline_mode = #tpu.pipeline_mode<synchronous>, transform_indices = @transform_3, window_bounds = array<i64: 256, 256>}, {pipeline_mode = #tpu.pipeline_mode<synchronous>, transform_indices = @transform_4, window_bounds = array<i64: 1, 256>}, {pipeline_mode = #tpu.pipeline_mode<synchronous>, transform_indices = @transform_5, window_bounds = array<i64: 256, 384>}, {pipeline_mode = #tpu.pipeline_mode<synchronous>, transform_indices = @transform_6, window_bounds = array<i64: 1, 384>}, {transform_indices = @transform_7, window_bounds = array<i64: 8, 384>}]} {
    %c0 = arith.constant 0 : index
    %c0_0 = arith.constant 0 : index
    %0 = vector.load %arg1[%c0, %c0_0] : memref<8x8xf32, #tpu.memory_space<vmem>>, vector<8x8xf32>
    %c0_1 = arith.constant 0 : index
    %c0_2 = arith.constant 0 : index
    %1 = vector.load %arg2[%c0_1, %c0_2] : memref<8x256xf32, #tpu.memory_space<vmem>>, vector<8x256xf32>
    %cst = arith.constant dense<0.000000e+00> : vector<8x256xf32>
    %2 = tpu.matmul %0, %1, %cst {dimension_numbers = #tpu.dot_dimension_numbers<[1], [0], [0], [1], [0, 0, 1, 1], [], []>} : vector<8x8xf32>, vector<8x256xf32>, vector<8x256xf32> -> vector<8x256xf32>
    %c0_3 = arith.constant 0 : index
    %c0_4 = arith.constant 0 : index
    %3 = vector.load %arg3[%c0_3, %c0_4] : memref<1x256xf32, #tpu.memory_space<vmem>>, vector<1x256xf32>
    %4 = vector.broadcast %3 : vector<1x256xf32> to vector<8x256xf32>
    %5 = arith.addf %2, %4 : vector<8x256xf32>
    %cst_5 = arith.constant 0.000000e+00 : f32
    %6 = vector.broadcast %cst_5 : f32 to vector<8x256xf32>
    %7 = arith.maximumf %5, %6 : vector<8x256xf32>
    %c0_6 = arith.constant 0 : index
    %c0_7 = arith.constant 0 : index
    %8 = vector.load %arg4[%c0_6, %c0_7] : memref<256x256xf32, #tpu.memory_space<vmem>>, vector<256x256xf32>
    %cst_8 = arith.constant dense<0.000000e+00> : vector<8x256xf32>
    %9 = tpu.matmul %7, %8, %cst_8 {dimension_numbers = #tpu.dot_dimension_numbers<[1], [0], [0], [1], [0, 0, 1, 1], [], []>} : vector<8x256xf32>, vector<256x256xf32>, vector<8x256xf32> -> vector<8x256xf32>
    %c0_9 = arith.constant 0 : index
    %c0_10 = arith.constant 0 : index
    %10 = vector.load %arg5[%c0_9, %c0_10] : memref<1x256xf32, #tpu.memory_space<vmem>>, vector<1x256xf32>
    %11 = vector.broadcast %10 : vector<1x256xf32> to vector<8x256xf32>
    %12 = arith.addf %9, %11 : vector<8x256xf32>
    %cst_11 = arith.constant 0.000000e+00 : f32
    %13 = vector.broadcast %cst_11 : f32 to vector<8x256xf32>
    %14 = arith.maximumf %12, %13 : vector<8x256xf32>
    %c0_12 = arith.constant 0 : index
    %c0_13 = arith.constant 0 : index
    %15 = vector.load %arg6[%c0_12, %c0_13] : memref<256x384xf32, #tpu.memory_space<vmem>>, vector<256x384xf32>
    %cst_14 = arith.constant dense<0.000000e+00> : vector<8x384xf32>
    %16 = tpu.matmul %14, %15, %cst_14 {dimension_numbers = #tpu.dot_dimension_numbers<[1], [0], [0], [1], [0, 0, 1, 1], [], []>} : vector<8x256xf32>, vector<256x384xf32>, vector<8x384xf32> -> vector<8x384xf32>
    %c0_15 = arith.constant 0 : index
    %c0_16 = arith.constant 0 : index
    %17 = vector.load %arg7[%c0_15, %c0_16] : memref<1x384xf32, #tpu.memory_space<vmem>>, vector<1x384xf32>
    %18 = vector.broadcast %17 : vector<1x384xf32> to vector<8x384xf32>
    %19 = arith.addf %16, %18 : vector<8x384xf32>
    %c0_17 = arith.constant 0 : index
    %c0_18 = arith.constant 0 : index
    %20 = vector.load %arg8[%c0_17, %c0_18] : memref<8x384xf32, #tpu.memory_space<vmem>>, vector<8x384xf32>
    tpu.vector_store %arg8[%c0_17, %c0_18], %19 {strides = array<i32>} : memref<8x384xf32, #tpu.memory_space<vmem>>, vector<8x384xf32>,
    return
  }
  func.func @transform_0(%arg0: i32) -> (i32, i32) {
    %c0_i32 = arith.constant 0 : i32
    %c0_i32_0 = arith.constant 0 : i32
    return %arg0, %c0_i32 : i32, i32
  }
  func.func @transform_1(%arg0: i32) -> (i32, i32) {
    %c0_i32 = arith.constant 0 : i32
    %c0_i32_0 = arith.constant 0 : i32
    %c0_i32_1 = arith.constant 0 : i32
    return %c0_i32, %c0_i32_0 : i32, i32
  }
  func.func @transform_2(%arg0: i32) -> (i32, i32) {
    %c0_i32 = arith.constant 0 : i32
    %c0_i32_0 = arith.constant 0 : i32
    %c0_i32_1 = arith.constant 0 : i32
    return %c0_i32, %c0_i32_0 : i32, i32
  }
  func.func @transform_3(%arg0: i32) -> (i32, i32) {
    %c0_i32 = arith.constant 0 : i32
    %c0_i32_0 = arith.constant 0 : i32
    %c0_i32_1 = arith.constant 0 : i32
    return %c0_i32, %c0_i32_0 : i32, i32
  }
  func.func @transform_4(%arg0: i32) -> (i32, i32) {
    %c0_i32 = arith.constant 0 : i32
    %c0_i32_0 = arith.constant 0 : i32
    %c0_i32_1 = arith.constant 0 : i32
    return %c0_i32, %c0_i32_0 : i32, i32
  }
  func.func @transform_5(%arg0: i32) -> (i32, i32) {
    %c0_i32 = arith.constant 0 : i32
    %c0_i32_0 = arith.constant 0 : i32
    %c0_i32_1 = arith.constant 0 : i32
    return %c0_i32, %c0_i32_0 : i32, i32
  }
  func.func @transform_6(%arg0: i32) -> (i32, i32) {
    %c0_i32 = arith.constant 0 : i32
    %c0_i32_0 = arith.constant 0 : i32
    %c0_i32_1 = arith.constant 0 : i32
    return %c0_i32, %c0_i32_0 : i32, i32
  }
  func.func @transform_7(%arg0: i32) -> (i32, i32) {
    %c0_i32 = arith.constant 0 : i32
    %c0_i32_0 = arith.constant 0 : i32
    return %arg0, %c0_i32 : i32, i32
  }
}

</mosaic_0001>

<bundles_post_ra>
// kernel: tpu_custom_call.1
= control target key start
LH: loop header
LB: loop body
LE: loop exit
PB: predicated region body
PF: predicated region fallthrough
CT: control target
= control target key end

     0   :  { %12 = vsyncpa [#allocation3], 0  ;;  %s1051_s0 = inlined_call_operand.hbm [shape: f32[8,8], index: 0, kind: input, shape index: {}]   ;;  %s1052_s1 = inlined_call_operand.hbm [shape: f32[8,256], index: 1, kind: input, shape index: {}]   ;;  %s1053_s2 = inlined_call_operand.vmem [shape: f32[1,256], index: 2, kind: input, shape index: {}]   ;;  %s1054_s3 = inlined_call_operand.hbm [shape: f32[256,256], index: 3, kind: input, shape index: {}]   ;;  %s1055_s4 = inlined_call_operand.vmem [shape: f32[1,256], index: 4, kind: input, shape index: {}]   ;;  %s1056_s5 = inlined_call_operand.hbm [shape: f32[256,384], index: 5, kind: input, shape index: {}]   ;;  %s1057_s6 = inlined_call_operand.vmem [shape: f32[1,384], index: 6, kind: input, shape index: {}]   ;;  %s1058_s7 = inlined_call_operand.hbm [shape: f32[8,384], index: 7, kind: output, shape index: {}]  }
   0x1   :  { %13 = vsyncpa [#allocation6], 0 }
   0x2   :  { %14 = vsyncpa [#allocation9], 0 }
   0x3   :  { %15 = vsyncpa [#allocation4], 0  ;;  %s917_s24 = smov [#allocation5]   ;;  %s918_s26 = smov [#allocation2]  }
   0x4   :  { %s32_s25 = sshll.u32 %s917_s24, 4  ;;  %s22_s27 = sshll.u32 %s918_s26, 4  ;;  %s33_s25 = int_to_ptr.vmem [resolvable:$true] %s32_s25  ;;  %s23_s27 = int_to_ptr.vmem [resolvable:$true] %s22_s27 }
   0x5   :  { %s799_s30 = scalar_lea.hbm %s1052_s1, 256 }
   0x6   :  { %p800_p0 = scmp.ne.s32.totalorder %s1052_s1, %s799_s30  ;;  %p803_p1 = scmp.lt.u32.totalorder %s799_s30, %s1052_s1 }
   0x8   :  { %p805_p2 = pnand %p803_p1, %p800_p0 }
   0xa   :  { %808 = shalt.err (!%p805_p2)
}
   0xb   :  { %s809_s12 = scalar_lea.vmem %s33_s25, 256  ;;  %p814_p4 = scmp.lt.s32.totalorder %s33_s25, %s33_s25 }
   0xc   :  { %p810_p3 = scmp.ne.s32.totalorder %s33_s25, %s809_s12  ;;  %p815_p5 = scmp.lt.s32.totalorder %s809_s12, %s809_s12 }
   0xe   :  { %p816_p6 = por %p815_p5, %p814_p4 }
  0x10   :  { %p817_p7 = pnand %p816_p6, %p810_p3 }
  0x12   :  { %820 = shalt.err (!%p817_p7)
}
  0x13   :  { %35 = dma.hbm_to_vmem [thread:$0]  %s1052_s1, 256, %s33_s25, [#allocation6]  }
  0x14   :  { %s821_s17 = scalar_lea.hbm %s1051_s0, 128 }
  0x15   :  { %p822_p8 = scmp.ne.s32.totalorder %s1051_s0, %s821_s17  ;;  %p825_p9 = scmp.lt.u32.totalorder %s821_s17, %s1051_s0 }
  0x17   :  { %p827_p10 = pnand %p825_p9, %p822_p8 }
  0x19   :  { %830 = shalt.err (!%p827_p10)
}
  0x1a   :  { %s831_s22 = scalar_lea.vmem %s23_s27, 128  ;;  %p836_p12 = scmp.lt.s32.totalorder %s23_s27, %s23_s27 }
  0x1b   :  { %p832_p11 = scmp.ne.s32.totalorder %s23_s27, %s831_s22  ;;  %p837_p13 = scmp.lt.s32.totalorder %s831_s22, %s831_s22 }
  0x1d   :  { %p838_p0 = por %p837_p13, %p836_p12 }
  0x1f   :  { %p839_p1 = pnand %p838_p0, %p832_p11 }
  0x21   :  { %842 = shalt.err (!%p839_p1)
}
  0x22   :  { %25 = dma.hbm_to_vmem [thread:$0]  %s1051_s0, 128, %s23_s27, [#allocation3]  }
  0x23   :  { %s919_s24 = smov [#allocation7]   ;;  %s843_s29 = scalar_lea.hbm %s1054_s3, 8192 }
  0x24   :  { %s43_s25 = sshll.u32 %s919_s24, 4  ;;  %p844_p2 = scmp.ne.s32.totalorder %s1054_s3, %s843_s29  ;;  %s44_s25 = int_to_ptr.vmem [resolvable:$true] %s43_s25 }
  0x25   :  { %p847_p3 = scmp.lt.u32.totalorder %s843_s29, %s1054_s3 }
  0x27   :  { %p849_p4 = pnand %p847_p3, %p844_p2 }
  0x29   :  { %852 = shalt.err (!%p849_p4)
}
  0x2a   :  { %s853_s11 = scalar_lea.vmem %s44_s25, 8192  ;;  %p858_p6 = scmp.lt.s32.totalorder %s44_s25, %s44_s25 }
  0x2b   :  { %p854_p5 = scmp.ne.s32.totalorder %s44_s25, %s853_s11  ;;  %p859_p7 = scmp.lt.s32.totalorder %s853_s11, %s853_s11 }
  0x2d   :  { %p860_p8 = por %p859_p7, %p858_p6 }
  0x2f   :  { %p861_p9 = pnand %p860_p8, %p854_p5 }
  0x31   :  { %864 = shalt.err (!%p861_p9)
}
  0x32   :  { %s920_s0 = smov 256   ;;  %s921_s27 = smov 16  }
  0x33   :  { %49 = dma.hbm_to_vmem [thread:$0]  %s1054_s3, 8192, %s44_s25, [#allocation6], %s920_s0, %s920_s0, %s921_s27  }
  0x34   :  { %s922_s14 = smov [#allocation8]   ;;  %s865_s18 = scalar_lea.hbm %s1056_s5, 12288 }
  0x35   :  { %s57_s15 = sshll.u32 %s922_s14, 4  ;;  %p866_p10 = scmp.ne.s32.totalorder %s1056_s5, %s865_s18  ;;  %s58_s15 = int_to_ptr.vmem [resolvable:$true] %s57_s15 }
  0x36   :  { %p869_p11 = scmp.lt.u32.totalorder %s865_s18, %s1056_s5 }
  0x38   :  { %p871_p12 = pnand %p869_p11, %p866_p10 }
  0x3a   :  { %874 = shalt.err (!%p871_p12)
}
  0x3b   :  { %s875_s1 = scalar_lea.vmem %s58_s15, 12288  ;;  %p880_p0 = scmp.lt.s32.totalorder %s58_s15, %s58_s15 }
  0x3c   :  { %p876_p13 = scmp.ne.s32.totalorder %s58_s15, %s875_s1  ;;  %p881_p1 = scmp.lt.s32.totalorder %s875_s1, %s875_s1 }
  0x3e   :  { %p882_p2 = por %p881_p1, %p880_p0 }
  0x40   :  { %p883_p3 = pnand %p882_p2, %p876_p13 }
  0x42   :  { %886 = shalt.err (!%p883_p3)
}
  0x43   :  { %s923_s3 = smov 384   ;;  %s924_s23 = smov 24  }
  0x44   :  { %63 = dma.hbm_to_vmem [thread:$0]  %s1056_s5, 12288, %s58_s15, [#allocation9], %s923_s3, %s923_s3, %s924_s23  }
  0x45   :  { %909 = dma.done.wait [#allocation3], 128  }
  0x46   :  { %910 = vsyncadd [#allocation3], 4294967168 }
  0x47   :  { %911 = dma.done.wait [#allocation6], 8448  }
  0x48   :  { %912 = vsyncadd [#allocation6], 4294958848 }
  0x49   :  { %913 = dma.done.wait [#allocation9], 12288  }
  0x4a   :  { %914 = vsyncadd [#allocation9], 4294955008  ;;  %v925_v0 = vmov 0.0   ;;  %v80_v1 = vld [vmem:[#allocation5 + $0x8] sm:$0xff]  ;;  %v79_v2 = vld [vmem:[#allocation5] sm:$0xff]  ;;  %vm93_vm0 = vcmask 64512  }
  0x4b   :  { %161 = vmatprep.mubr.f32.mxu0 %v925_v0  ;;  %v78_v3 = vld [vmem:[#allocation2] sm:$0xff]  ;;  %97 = vmatprep.subr.mxu0 %v80_v1  ;;  %v173_v5 = vld [vmem:[#allocation7 + $0x18] sm:$0xff]  ;;  %v170_v6 = vld [vmem:[#allocation7] sm:$0xff] }
  0x4c   :  { %v171_v4 = vld [vmem:[#allocation7 + $0x8] sm:$0xff]  ;;  %98 = vmatpush1.msra.mxu0 %v79_v2  ;;  %v172_v8 = vld [vmem:[#allocation7 + $0x10] sm:$0xff]  ;;  %v177_v10 = vld [vmem:[#allocation7 + $0x38] sm:$0xff] }
  0x4d   :  { %v629_v7 = vpack.c.bf16 %v173_v5, %v171_v4  ;;  %v175_v9 = vld [vmem:[#allocation7 + $0x28] sm:$0xff]  ;;  %593 = vmatmul.mubr.msk.f32.vlgmr.msra.gmra.mrb[0].mxu0 %vm93_vm0, %v78_v3  ;;  %v631_v11 = vpack.c.bf16 %v172_v8, %v170_v6  ;;  %v174_v13 = vld [vmem:[#allocation7 + $0x20] sm:$0xff]  ;;  %v176_v14 = vld [vmem:[#allocation7 + $0x30] sm:$0xff] }
  0x4e   :  { %v633_v12 = vpack.c.bf16 %v177_v10, %v175_v9  ;;  %v179_v15 = vld [vmem:[#allocation7 + $0x48] sm:$0xff]  ;;  %v181_v16 = vld [vmem:[#allocation7 + $0x58] sm:$0xff]  ;;  %v635_v17 = vpack.c.bf16 %v176_v14, %v174_v13  ;;  %v178_v19 = vld [vmem:[#allocation7 + $0x40] sm:$0xff] }
  0x4f   :  { %630 = vmatprep.subr.bf16.mxu1 %v629_v7  ;;  %v637_v18 = vpack.c.bf16 %v181_v16, %v179_v15  ;;  %v180_v20 = vld [vmem:[#allocation7 + $0x50] sm:$0xff]  ;;  %v183_v21 = vld [vmem:[#allocation7 + $0x68] sm:$0xff]  ;;  %v185_v22 = vld [vmem:[#allocation7 + $0x78] sm:$0xff] }
  0x50   :  { %632 = vmatpush1.bf16.msra.mxu1 %v631_v11  ;;  %v639_v23 = vpack.c.bf16 %v180_v20, %v178_v19  ;;  %v641_v24 = vpack.c.bf16 %v185_v22, %v183_v21  ;;  %v182_v25 = vld [vmem:[#allocation7 + $0x60] sm:$0xff]  ;;  %v184_v26 = vld [vmem:[#allocation7 + $0x70] sm:$0xff]  ;;  %v187_v27 = vld [vmem:[#allocation7 + $0x88] sm:$0xff] }
  0x51   :  { %634 = vmatprep.subr.bf16.mxu1 %v633_v12  ;;  %v189_v28 = vld [vmem:[#allocation7 + $0x98] sm:$0xff]  ;;  %v643_v29 = vpack.c.bf16 %v184_v26, %v182_v25  ;;  %v186_v31 = vld [vmem:[#allocation7 + $0x80] sm:$0xff]  ;;  %v188_v32 = vld [vmem:[#allocation7 + $0x90] sm:$0xff] }
  0x52   :  { %v645_v30 = vpack.c.bf16 %v189_v28, %v187_v27  ;;  %v191_v33 = vld [vmem:[#allocation7 + $0xa8] sm:$0xff]  ;;  %v193_v34 = vld [vmem:[#allocation7 + $0xb8] sm:$0xff]  ;;  %v647_v35 = vpack.c.bf16 %v188_v32, %v186_v31  ;;  %v190_v37 = vld [vmem:[#allocation7 + $0xa0] sm:$0xff] }
  0x53   :  { %v649_v36 = vpack.c.bf16 %v193_v34, %v191_v33  ;;  %v192_v38 = vld [vmem:[#allocation7 + $0xb0] sm:$0xff]  ;;  %v195_v39 = vld [vmem:[#allocation7 + $0xc8] sm:$0xff]  ;;  %v197_v40 = vld [vmem:[#allocation7 + $0xd8] sm:$0xff] }
  0x54   :  { %636 = vmatpush1.bf16.msra.mxu1 %v635_v17  ;;  %v651_v41 = vpack.c.bf16 %v192_v38, %v190_v37  ;;  %v653_v42 = vpack.c.bf16 %v197_v40, %v195_v39  ;;  %v194_v43 = vld [vmem:[#allocation7 + $0xc0] sm:$0xff]  ;;  %v196_v44 = vld [vmem:[#allocation7 + $0xd0] sm:$0xff]  ;;  %v199_v45 = vld [vmem:[#allocation7 + $0xe8] sm:$0xff] }
  0x55   :  { %638 = vmatprep.subr.bf16.mxu1 %v637_v18  ;;  %v201_v46 = vld [vmem:[#allocation7 + $0xf8] sm:$0xff]  ;;  %v655_v47 = vpack.c.bf16 %v196_v44, %v194_v43  ;;  %v198_v49 = vld [vmem:[#allocation7 + $0xe0] sm:$0xff]  ;;  %v200_v50 = vld [vmem:[#allocation7 + $0xf0] sm:$0xff] }
  0x56   :  { %v657_v48 = vpack.c.bf16 %v201_v46, %v199_v45  ;;  %v203_v51 = vld [vmem:[#allocation7 + $0x108] sm:$0xff]  ;;  %v205_v52 = vld [vmem:[#allocation7 + $0x118] sm:$0xff]  ;;  %v659_v53 = vpack.c.bf16 %v200_v50, %v198_v49  ;;  %v202_v55 = vld [vmem:[#allocation7 + $0x100] sm:$0xff] }
  0x57   :  { %v661_v54 = vpack.c.bf16 %v205_v52, %v203_v51  ;;  %v204_v56 = vld [vmem:[#allocation7 + $0x110] sm:$0xff]  ;;  %v207_v57 = vld [vmem:[#allocation7 + $0x128] sm:$0xff]  ;;  %v209_v58 = vld [vmem:[#allocation7 + $0x138] sm:$0xff] }
  0x58   :  { %640 = vmatpush1.bf16.msra.mxu1 %v639_v23  ;;  %v663_v59 = vpack.c.bf16 %v204_v56, %v202_v55  ;;  %v665_v60 = vpack.c.bf16 %v209_v58, %v207_v57  ;;  %v206_v61 = vld [vmem:[#allocation7 + $0x120] sm:$0xff]  ;;  %v208_v62 = vld [vmem:[#allocation7 + $0x130] sm:$0xff]  ;;  %v211_v63 = vld [vmem:[#allocation7 + $0x148] sm:$0xff] }
  0x59   :  { %642 = vmatprep.subr.bf16.mxu1 %v641_v24  ;;  %v213_v0 = vld [vmem:[#allocation7 + $0x158] sm:$0xff]  ;;  %v667_v1 = vpack.c.bf16 %v208_v62, %v206_v61  ;;  %v210_v3 = vld [vmem:[#allocation7 + $0x140] sm:$0xff]  ;;  %v212_v4 = vld [vmem:[#allocation7 + $0x150] sm:$0xff] }
  0x5a   :  { %v669_v2 = vpack.c.bf16 %v213_v0, %v211_v63  ;;  %v215_v5 = vld [vmem:[#allocation7 + $0x168] sm:$0xff]  ;;  %v217_v6 = vld [vmem:[#allocation7 + $0x178] sm:$0xff]  ;;  %v671_v7 = vpack.c.bf16 %v212_v4, %v210_v3  ;;  %v214_v9 = vld [vmem:[#allocation7 + $0x160] sm:$0xff] }
  0x5b   :  { %v673_v8 = vpack.c.bf16 %v217_v6, %v215_v5  ;;  %v216_v10 = vld [vmem:[#allocation7 + $0x170] sm:$0xff]  ;;  %v219_v11 = vld [vmem:[#allocation7 + $0x188] sm:$0xff]  ;;  %v221_v12 = vld [vmem:[#allocation7 + $0x198] sm:$0xff] }
  0x5c   :  { %644 = vmatpush1.bf16.msra.mxu1 %v643_v29  ;;  %v675_v13 = vpack.c.bf16 %v216_v10, %v214_v9  ;;  %v677_v14 = vpack.c.bf16 %v221_v12, %v219_v11  ;;  %v218_v15 = vld [vmem:[#allocation7 + $0x180] sm:$0xff]  ;;  %v220_v16 = vld [vmem:[#allocation7 + $0x190] sm:$0xff]  ;;  %v223_v17 = vld [vmem:[#allocation7 + $0x1a8] sm:$0xff] }
  0x5d   :  { %646 = vmatprep.subr.bf16.mxu1 %v645_v30  ;;  %v225_v18 = vld [vmem:[#allocation7 + $0x1b8] sm:$0xff]  ;;  %v679_v19 = vpack.c.bf16 %v220_v16, %v218_v15  ;;  %v222_v21 = vld [vmem:[#allocation7 + $0x1a0] sm:$0xff]  ;;  %v224_v22 = vld [vmem:[#allocation7 + $0x1b0] sm:$0xff] }
  0x5e   :  { %v681_v20 = vpack.c.bf16 %v225_v18, %v223_v17  ;;  %v227_v23 = vld [vmem:[#allocation7 + $0x1c8] sm:$0xff]  ;;  %v229_v24 = vld [vmem:[#allocation7 + $0x1d8] sm:$0xff]  ;;  %v683_v25 = vpack.c.bf16 %v224_v22, %v222_v21  ;;  %v226_v27 = vld [vmem:[#allocation7 + $0x1c0] sm:$0xff] }
  0x5f   :  { %v685_v26 = vpack.c.bf16 %v229_v24, %v227_v23  ;;  %v228_v28 = vld [vmem:[#allocation7 + $0x1d0] sm:$0xff]  ;;  %v231_v30 = vld [vmem:[#allocation7 + $0x1e8] sm:$0xff]  ;;  %v233_v31 = vld [vmem:[#allocation7 + $0x1f8] sm:$0xff] }
  0x60   :  { %648 = vmatpush1.bf16.msra.mxu1 %v647_v35  ;;  %v687_v29 = vpack.c.bf16 %v228_v28, %v226_v27  ;;  %v689_v32 = vpack.c.bf16 %v233_v31, %v231_v30  ;;  %v230_v33 = vld [vmem:[#allocation7 + $0x1e0] sm:$0xff]  ;;  %v232_v34 = vld [vmem:[#allocation7 + $0x1f0] sm:$0xff]  ;;  %v322_v40 = vld [vmem:[#allocation8 + $0x18] sm:$0xff] }
  0x61   :  { %650 = vmatprep.subr.bf16.mxu1 %v649_v36  ;;  %v691_v35 = vpack.c.bf16 %v232_v34, %v230_v33  ;;  %v320_v36 = vld [vmem:[#allocation8 + $0x8] sm:$0xff]  ;;  %v323_v37 = vld [vmem:[#allocation8 + $0x20] sm:$0xff]  ;;  %v325_v45 = vld [vmem:[#allocation8 + $0x30] sm:$0xff] }
  0x62   :  { %v319_v38 = vld [vmem:[#allocation8] sm:$0xff]  ;;  %v693_v39 = vpack.c.bf16 %v323_v37, %v320_v36  ;;  %v328_v46 = vld [vmem:[#allocation8 + $0x48] sm:$0xff]  ;;  %v334_v52 = vld [vmem:[#allocation8 + $0x78] sm:$0xff] }
  0x63   :  { %v695_v43 = vpack.c.bf16 %v322_v40, %v319_v38  ;;  %v699_v49 = vpack.c.bf16 %v328_v46, %v325_v45  ;;  %v331_v51 = vld [vmem:[#allocation8 + $0x60] sm:$0xff]  ;;  %v337_v57 = vld [vmem:[#allocation8 + $0x90] sm:$0xff]  ;;  %v340_v58 = vld [vmem:[#allocation8 + $0xa8] sm:$0xff] }
  0x64   :  { %652 = vmatpush1.bf16.msra.mxu1 %v651_v41  ;;  %v326_v41 = vld [vmem:[#allocation8 + $0x38] sm:$0xff]  ;;  %694 = vmatprep.subr.bf16.mxu0 %v693_v39  ;;  %v703_v55 = vpack.c.bf16 %v334_v52, %v331_v51  ;;  %v369_v61 = vld [vmem:[#allocation8 + $0x190] sm:$0xff]  ;;  %v372_v62 = vld [vmem:[#allocation8 + $0x1a8] sm:$0xff]  ;;  %v707_v63 = vpack.c.bf16 %v340_v58, %v337_v57 }
  0x65   :  { %654 = vmatprep.subr.bf16.mxu1 %v653_v42  ;;  %v329_v42 = vld [vmem:[#allocation8 + $0x50] sm:$0xff]  ;;  %696 = vmatpush1.bf16.msra.mxu0 %v695_v43  ;;  %v757_v0 = vpack.c.bf16 %v372_v62, %v369_v61  ;;  %v346_v3 = vld [vmem:[#allocation8 + $0xd8] sm:$0xff]  ;;  %v352_v9 = vld [vmem:[#allocation8 + $0x108] sm:$0xff]  ;;  %v83_v62 = vlaneseq }
  0x66   :  { %v697_v44 = vpack.c.bf16 %v329_v42, %v326_v41  ;;  %v350_v4 = vld [vmem:[#allocation8 + $0xf8] sm:$0xff]  ;;  %v353_v5 = vld [vmem:[#allocation8 + $0x110] sm:$0xff]  ;;  %v356_v10 = vld [vmem:[#allocation8 + $0x128] sm:$0xff] }
  0x67   :  { %v359_v11 = vld [vmem:[#allocation8 + $0x140] sm:$0xff]  ;;  %v358_v15 = vld [vmem:[#allocation8 + $0x138] sm:$0xff]  ;;  %v365_v17 = vld [vmem:[#allocation8 + $0x170] sm:$0xff] }
  0x68   :  { %656 = vmatpush1.bf16.msra.mxu1 %v655_v47  ;;  %v332_v47 = vld [vmem:[#allocation8 + $0x68] sm:$0xff]  ;;  %698 = vmatprep.subr.bf16.mxu0 %v697_v44  ;;  %v362_v16 = vld [vmem:[#allocation8 + $0x158] sm:$0xff]  ;;  %v371_v23 = vld [vmem:[#allocation8 + $0x1a0] sm:$0xff] }
  0x69   :  { %658 = vmatprep.subr.bf16.mxu1 %v657_v48  ;;  %v335_v48 = vld [vmem:[#allocation8 + $0x80] sm:$0xff]  ;;  %700 = vmatpush1.bf16.msra.mxu0 %v699_v49  ;;  %v364_v21 = vld [vmem:[#allocation8 + $0x168] sm:$0xff]  ;;  %v370_v27 = vld [vmem:[#allocation8 + $0x198] sm:$0xff] }
  0x6a   :  { %v701_v50 = vpack.c.bf16 %v335_v48, %v332_v47  ;;  %v368_v22 = vld [vmem:[#allocation8 + $0x188] sm:$0xff]  ;;  %v374_v28 = vld [vmem:[#allocation8 + $0x1b8] sm:$0xff]  ;;  %v379_v38 = vld [vmem:[#allocation8 + $0x1e0] sm:$0xff] }
  0x6b   :  { %v376_v33 = vld [vmem:[#allocation8 + $0x1c8] sm:$0xff]  ;;  %v382_v39 = vld [vmem:[#allocation8 + $0x1f8] sm:$0xff]  ;;  %v389_v41 = vld [vmem:[#allocation8 + $0x230] sm:$0xff] }
  0x6c   :  { %660 = vmatpush1.bf16.msra.mxu1 %v659_v53  ;;  %v338_v53 = vld [vmem:[#allocation8 + $0x98] sm:$0xff]  ;;  %702 = vmatprep.subr.bf16.mxu0 %v701_v50  ;;  %v380_v34 = vld [vmem:[#allocation8 + $0x1e8] sm:$0xff]  ;;  %v735_v42 = vpack.c.bf16 %v382_v39, %v379_v38  ;;  %v385_v44 = vld [vmem:[#allocation8 + $0x210] sm:$0xff] }
  0x6d   :  { %662 = vmatprep.subr.bf16.mxu1 %v661_v54  ;;  %v341_v54 = vld [vmem:[#allocation8 + $0xb0] sm:$0xff]  ;;  %704 = vmatpush1.bf16.msra.mxu0 %v703_v55  ;;  %v386_v40 = vld [vmem:[#allocation8 + $0x218] sm:$0xff]  ;;  %v388_v45 = vld [vmem:[#allocation8 + $0x228] sm:$0xff] }
  0x6e   :  { %v705_v56 = vpack.c.bf16 %v341_v54, %v338_v53  ;;  %v737_v43 = vpack.c.bf16 %v389_v41, %v386_v40  ;;  %v392_v46 = vld [vmem:[#allocation8 + $0x248] sm:$0xff]  ;;  %v395_v47 = vld [vmem:[#allocation8 + $0x260] sm:$0xff]  ;;  %v739_v48 = vpack.c.bf16 %v388_v45, %v385_v44  ;;  %v394_v51 = vld [vmem:[#allocation8 + $0x258] sm:$0xff] }
  0x6f   :  { %v741_v49 = vpack.c.bf16 %v395_v47, %v392_v46  ;;  %v391_v50 = vld [vmem:[#allocation8 + $0x240] sm:$0xff]  ;;  %v398_v52 = vld [vmem:[#allocation8 + $0x278] sm:$0xff]  ;;  %v401_v53 = vld [vmem:[#allocation8 + $0x290] sm:$0xff] }
  0x70   :  { %664 = vmatpush1.bf16.msra.mxu1 %v663_v59  ;;  %v344_v59 = vld [vmem:[#allocation8 + $0xc8] sm:$0xff]  ;;  %706 = vmatprep.subr.bf16.mxu0 %v705_v56  ;;  %v743_v54 = vpack.c.bf16 %v394_v51, %v391_v50  ;;  %v745_v55 = vpack.c.bf16 %v401_v53, %v398_v52  ;;  %v397_v56 = vld [vmem:[#allocation8 + $0x270] sm:$0xff]  ;;  %v402_v38 = vld [vmem:[#allocation8 + $0x298] sm:$0xff] }
  0x71   :  { %666 = vmatprep.subr.bf16.mxu1 %v665_v60  ;;  %v347_v60 = vld [vmem:[#allocation8 + $0xe0] sm:$0xff]  ;;  %708 = vmatpush1.bf16.msra.mxu0 %v707_v63  ;;  %v400_v57 = vld [vmem:[#allocation8 + $0x288] sm:$0xff]  ;;  %v1015_v63 = vshrl.u32 %v83_v62, 7  ;;  %v410_v53 = vld [vmem:[#allocation8 + $0x2d8] sm:$0xff] }
  0x72   :  { %v404_v58 = vld [vmem:[#allocation8 + $0x2a8] sm:$0xff]  ;;  %v351_v41 = vld [vmem:[#allocation8 + $0x100] sm:$0xff] }
  0x73   :  { %v408_v44 = vld [vmem:[#allocation8 + $0x2c8] sm:$0xff]  ;;  %v403_v47 = vld [vmem:[#allocation8 + $0x2a0] sm:$0xff] }
  0x74   :  { %668 = vmatpush1.bf16.msra.mxu1 %v667_v1  ;;  %v709_v1 = vpack.c.bf16 %v347_v60, %v344_v59  ;;  %v407_v59 = vld [vmem:[#allocation8 + $0x2c0] sm:$0xff]  ;;  %v747_v60 = vpack.c.bf16 %v400_v57, %v397_v56  ;;  %v360_v51 = vld [vmem:[#allocation8 + $0x148] sm:$0xff]  ;;  %v414_v57 = vld [vmem:[#allocation8 + $0x2f8] sm:$0xff] }
  0x75   :  { %670 = vmatprep.subr.bf16.mxu1 %v669_v2  ;;  %v343_v2 = vld [vmem:[#allocation8 + $0xc0] sm:$0xff]  ;;  %v749_v61 = vpack.c.bf16 %v407_v59, %v404_v58  ;;  %v409_v58 = vld [vmem:[#allocation8 + $0x2d0] sm:$0xff]  ;;  %v412_v59 = vld [vmem:[#allocation8 + $0x2e8] sm:$0xff] }
  0x76   :  { %v711_v6 = vpack.c.bf16 %v346_v3, %v343_v2  ;;  %710 = vmatprep.subr.bf16.mxu0 %v709_v1  ;;  %v81_v1 = vld [vmem:[%s1053_s2] sm:$0x3]  ;;  %v1024_v2 = vsub.s32 1, %v1015_v63  ;;  %v363_v62 = vld [vmem:[#allocation8 + $0x160] sm:$0xff] }
  0x78   :  { %672 = vmatpush1.bf16.msra.mxu1 %v671_v7  ;;  %v713_v7 = vpack.c.bf16 %v353_v5, %v350_v4  ;;  %712 = vmatpush1.bf16.msra.mxu0 %v711_v6  ;;  %v90_v4 = vrot.slane %v81_v1, %v1024_v2 }
  0x79   :  { %674 = vmatprep.subr.bf16.mxu1 %v673_v8  ;;  %v349_v8 = vld [vmem:[#allocation8 + $0xf0] sm:$0xff] }
  0x7a   :  { %v715_v12 = vpack.c.bf16 %v352_v9, %v349_v8  ;;  %714 = vmatprep.subr.bf16.mxu0 %v713_v7  ;;  %v321_v8 = vld [vmem:[#allocation8 + $0x10] sm:$0xff]  ;;  %v324_v9 = vld [vmem:[#allocation8 + $0x28] sm:$0xff] }
  0x7c   :  { %676 = vmatpush1.bf16.msra.mxu1 %v675_v13  ;;  %v717_v13 = vpack.c.bf16 %v359_v11, %v356_v10  ;;  %716 = vmatpush1.bf16.msra.mxu0 %v715_v12  ;;  %v375_v11 = vld [vmem:[#allocation8 + $0x1c0] sm:$0xff]  ;;  %v378_v12 = vld [vmem:[#allocation8 + $0x1d8] sm:$0xff] }
  0x7d   :  { %678 = vmatprep.subr.bf16.mxu1 %v677_v14  ;;  %v355_v14 = vld [vmem:[#allocation8 + $0x120] sm:$0xff] }
  0x7e   :  { %v719_v18 = vpack.c.bf16 %v358_v15, %v355_v14  ;;  %718 = vmatprep.subr.bf16.mxu0 %v717_v13  ;;  %v759_v14 = vpack.c.bf16 %v324_v9, %v321_v8 }
  0x80   :  { %680 = vmatpush1.bf16.msra.mxu1 %v679_v19  ;;  %v721_v19 = vpack.c.bf16 %v365_v17, %v362_v16  ;;  %720 = vmatpush1.bf16.msra.mxu0 %v719_v18  ;;  %v761_v16 = vpack.c.bf16 %v378_v12, %v375_v11  ;;  %v327_v17 = vld [vmem:[#allocation8 + $0x40] sm:$0xff]  ;;  %v330_v18 = vld [vmem:[#allocation8 + $0x58] sm:$0xff] }
  0x81   :  { %682 = vmatprep.subr.bf16.mxu1 %v681_v20  ;;  %v361_v20 = vld [vmem:[#allocation8 + $0x150] sm:$0xff] }
  0x82   :  { %v723_v24 = vpack.c.bf16 %v364_v21, %v361_v20  ;;  %722 = vmatprep.subr.bf16.mxu0 %v721_v19  ;;  %v381_v19 = vld [vmem:[#allocation8 + $0x1f0] sm:$0xff]  ;;  %v384_v20 = vld [vmem:[#allocation8 + $0x208] sm:$0xff]  ;;  %v763_v21 = vpack.c.bf16 %v330_v18, %v327_v17 }
  0x84   :  { %684 = vmatpush1.bf16.msra.mxu1 %v683_v25  ;;  %v725_v25 = vpack.c.bf16 %v371_v23, %v368_v22  ;;  %724 = vmatpush1.bf16.msra.mxu0 %v723_v24  ;;  %v765_v22 = vpack.c.bf16 %v384_v20, %v381_v19  ;;  %v333_v23 = vld [vmem:[#allocation8 + $0x70] sm:$0xff]  ;;  %v336_v24 = vld [vmem:[#allocation8 + $0x88] sm:$0xff] }
  0x85   :  { %686 = vmatprep.subr.bf16.mxu1 %v685_v26  ;;  %v367_v26 = vld [vmem:[#allocation8 + $0x180] sm:$0xff] }
  0x86   :  { %v727_v30 = vpack.c.bf16 %v370_v27, %v367_v26  ;;  %726 = vmatprep.subr.bf16.mxu0 %v725_v25  ;;  %v387_v25 = vld [vmem:[#allocation8 + $0x220] sm:$0xff]  ;;  %v390_v26 = vld [vmem:[#allocation8 + $0x238] sm:$0xff]  ;;  %v767_v27 = vpack.c.bf16 %v336_v24, %v333_v23 }
  0x88   :  { %688 = vmatpush1.bf16.msra.mxu1 %v687_v29  ;;  %v377_v29 = vld [vmem:[#allocation8 + $0x1d0] sm:$0xff]  ;;  %728 = vmatpush1.bf16.msra.mxu0 %v727_v30  ;;  %v342_v30 = vld [vmem:[#allocation8 + $0xb8] sm:$0xff] }
  0x89   :  { %690 = vmatprep.subr.bf16.mxu1 %v689_v32  ;;  %v729_v31 = vpack.c.bf16 %v377_v29, %v374_v28  ;;  %v373_v32 = vld [vmem:[#allocation8 + $0x1b0] sm:$0xff]  ;;  %v769_v28 = vpack.c.bf16 %v390_v26, %v387_v25  ;;  %v339_v29 = vld [vmem:[#allocation8 + $0xa0] sm:$0xff] }
  0x8a   :  { %v731_v36 = vpack.c.bf16 %v376_v33, %v373_v32  ;;  %v396_v32 = vld [vmem:[#allocation8 + $0x268] sm:$0xff]  ;;  %v771_v33 = vpack.c.bf16 %v342_v30, %v339_v29 }
  0x8b   :  { %730 = vmatprep.subr.bf16.mxu0 %v729_v31  ;;  %v393_v31 = vld [vmem:[#allocation8 + $0x250] sm:$0xff] }
  0x8c   :  { %692 = vmatpush1.bf16.msra.mxu1 %v691_v35  ;;  %v383_v35 = vld [vmem:[#allocation8 + $0x200] sm:$0xff]  ;;  %732 = vmatpush1.bf16.msra.mxu0 %v731_v36  ;;  %v348_v36 = vld [vmem:[#allocation8 + $0xe8] sm:$0xff] }
  0x8d   :  { %758 = vmatprep.subr.bf16.mxu1 %v757_v0  ;;  %v733_v37 = vpack.c.bf16 %v383_v35, %v380_v34  ;;  %v1018_v0 = vsub.s32 0, %v1015_v63  ;;  %v773_v34 = vpack.c.bf16 %v396_v32, %v393_v31  ;;  %v345_v35 = vld [vmem:[#allocation8 + $0xd0] sm:$0xff] }
  0x8e   :  { %v775_v39 = vpack.c.bf16 %v348_v36, %v345_v35 }
  0x8f   :  { %734 = vmatprep.subr.bf16.mxu0 %v733_v37  ;;  %v86_v3 = vrot.slane %v81_v1, %v1018_v0  ;;  %v399_v37 = vld [vmem:[#allocation8 + $0x280] sm:$0xff]  ;;  %v366_v1 = vld [vmem:[#allocation8 + $0x178] sm:$0xff] }
  0x90   :  { %736 = vmatpush1.bf16.msra.mxu0 %v735_v42  ;;  %v777_v40 = vpack.c.bf16 %v402_v38, %v399_v37  ;;  %v354_v42 = vld [vmem:[#allocation8 + $0x118] sm:$0xff] }
  0x91   :  { %738 = vmatprep.subr.bf16.mxu0 %v737_v43  ;;  %v405_v43 = vld [vmem:[#allocation8 + $0x2b0] sm:$0xff]  ;;  %v779_v45 = vpack.c.bf16 %v354_v42, %v351_v41 }
  0x92   :  { %v781_v46 = vpack.c.bf16 %v408_v44, %v405_v43 }
  0x94   :  { %740 = vmatpush1.bf16.msra.mxu0 %v739_v48  ;;  %v406_v48 = vld [vmem:[#allocation8 + $0x2b8] sm:$0xff] }
  0x95   :  { %742 = vmatprep.subr.bf16.mxu0 %v741_v49  ;;  %v357_v49 = vld [vmem:[#allocation8 + $0x130] sm:$0xff]  ;;  %v751_v50 = vpack.c.bf16 %v406_v48, %v403_v47 }
  0x96   :  { %v783_v52 = vpack.c.bf16 %v360_v51, %v357_v49 }
  0x98   :  { %744 = vmatpush1.bf16.msra.mxu0 %v743_v54  ;;  %v413_v54 = vld [vmem:[#allocation8 + $0x2f0] sm:$0xff] }
  0x99   :  { %746 = vmatprep.subr.bf16.mxu0 %v745_v55  ;;  %v411_v55 = vld [vmem:[#allocation8 + $0x2e0] sm:$0xff]  ;;  %v753_v56 = vpack.c.bf16 %v413_v54, %v410_v53 }
  0x9c   :  { %748 = vmatpush1.bf16.msra.mxu0 %v747_v60  ;;  %v785_v60 = vpack.c.bf16 %v414_v57, %v411_v55 }
  0x9d   :  { %750 = vmatprep.subr.bf16.mxu0 %v749_v61  ;;  %v755_v61 = vpack.c.bf16 %v412_v59, %v409_v58 }
  0xa0   :  { %752 = vmatpush1.bf16.msra.mxu0 %v751_v50 }
  0xa1   :  { %754 = vmatprep.subr.bf16.mxu0 %v753_v56 }
  0xa4   :  { %756 = vmatpush1.bf16.msra.mxu0 %v755_v61 }
 0x120   :  { %v163_v5 = vpop.f32.mrb[0].mxu0 }
 0x121   :  { %v164_v6 = vadd.f32 %v163_v5, %v86_v3  ;;  %v165_v7 = vpop.f32.mrb[1].mxu0  ;;  %v787_v3 = vpack.c.bf16 %v366_v1, %v363_v62 }
 0x122   :  { %v166_v10 = vadd.f32 %v165_v7, %v90_v4  ;;  %v234_v4 = vld [vmem:[%s1055_s4] sm:$0x3]  ;;  %s926_s4 = smov [#allocation10]  }
 0x123   :  { %v168_v15 = vmax.f32 %v164_v6, 0.0  ;;  %v239_v5 = vrot.slane %v234_v4, %v1018_v0  ;;  %v243_v6 = vrot.slane %v234_v4, %v1024_v2  ;;  %s582_s8 = sshll.u32 %s926_s4, 4  ;;  %s583_s8 = int_to_ptr.vmem [resolvable:$true] %s582_s8 }
 0x124   :  { %v169_v13 = vmax.f32 %v166_v10, 0.0  ;;  %p892_p5 = scmp.lt.s32.totalorder %s583_s8, %s583_s8 }
 0x126   :  { %310 = vmatprep.mubr.f32.mxu1 %v169_v13  ;;  %v415_v13 = vld [vmem:[%s1057_s6] sm:$0x7]  ;;  %s887_s6 = scalar_lea.vmem %s583_s8, 384 }
 0x127   :  { %311 = vmatmul.mubr.f32.vlgmr.msra.gmra.mrb[0].mxu1 %v168_v15  ;;  %v420_v15 = vrot.slane %v415_v13, %v1018_v0  ;;  %p888_p4 = scmp.ne.s32.totalorder %s583_s8, %s887_s6  ;;  %p893_p6 = scmp.lt.s32.totalorder %s887_s6, %s887_s6 }
 0x128   :  { %760 = vmatpush3.bf16.msra.mxu1 %v759_v14  ;;  %v427_v14 = vsub.s32 2, %v1015_v63 }
 0x129   :  { %762 = vmatprep.subr.bf16.mxu1 %v761_v16  ;;  %v424_v16 = vrot.slane %v415_v13, %v1024_v2  ;;  %p894_p7 = por %p893_p6, %p892_p5 }
 0x12a   :  { %v428_v19 = vrot.slane %v415_v13, %v427_v14 }
 0x12b   :  { %p895_p8 = pnand %p894_p7, %p888_p4 }
 0x12c   :  { %764 = vmatpush3.bf16.msra.mxu1 %v763_v21 }
 0x12d   :  { %766 = vmatprep.subr.bf16.mxu1 %v765_v22 }
 0x130   :  { %768 = vmatpush3.bf16.msra.mxu1 %v767_v27 }
 0x131   :  { %770 = vmatprep.subr.bf16.mxu1 %v769_v28 }
 0x134   :  { %772 = vmatpush3.bf16.msra.mxu1 %v771_v33 }
 0x135   :  { %774 = vmatprep.subr.bf16.mxu1 %v773_v34 }
 0x138   :  { %776 = vmatpush3.bf16.msra.mxu1 %v775_v39 }
 0x139   :  { %778 = vmatprep.subr.bf16.mxu1 %v777_v40 }
 0x13c   :  { %780 = vmatpush3.bf16.msra.mxu1 %v779_v45 }
 0x13d   :  { %782 = vmatprep.subr.bf16.mxu1 %v781_v46 }
 0x140   :  { %784 = vmatpush3.bf16.msra.mxu1 %v783_v52 }
 0x141   :  { %786 = vmatprep.subr.bf16.mxu1 %v785_v60 }
 0x144   :  { %788 = vmatpush3.bf16.msra.mxu1 %v787_v3 }
 0x1fa   :  { %v312_v7 = vpop.f32.mrb[0].mxu1 }
 0x1fb   :  { %v313_v8 = vadd.f32 %v312_v7, %v239_v5  ;;  %v314_v9 = vpop.f32.mrb[1].mxu1 }
 0x1fc   :  { %v315_v10 = vadd.f32 %v314_v9, %v243_v6 }
 0x1fd   :  { %v317_v12 = vmax.f32 %v313_v8, 0.0 }
 0x1fe   :  { %v318_v11 = vmax.f32 %v315_v10, 0.0 }
 0x200   :  { %496 = vmatprep.mubr.f32.mxu0 %v318_v11  ;;  %567 = vmatprep.mubr.f32.mxu1 %v318_v11 }
 0x201   :  { %497 = vmatmul.mubr.f32.vlgmr.msra.gmra.mrb[2].mxu0 %v317_v12  ;;  %568 = vmatmul.mubr.f32.vlgmr.msra.gmra.mrb[2].mxu1 %v317_v12 }
 0x2d4   :  { %v498_v17 = vpop.f32.mrb[2].mxu0  ;;  %v626_v18 = vpop.f32.mrb[2].mxu1 }
 0x2d5   :  { %v499_v20 = vadd.f32 %v498_v17, %v420_v15  ;;  %v500_v21 = vpop.f32.mrb[3].mxu0  ;;  %v627_v22 = vpop.f32.mrb[3].mxu1 }
 0x2d6   :  { %v501_v23 = vadd.f32 %v500_v21, %v424_v16  ;;  %v628_v24 = vadd.f32 %v627_v22, %v626_v18 }
 0x2d7   :  { %573 = vst [vmem:[#allocation10] sm:$0xff] %v499_v20 }
 0x2d8   :  { %574 = vst [vmem:[#allocation10 + $0x8] sm:$0xff] %v501_v23  ;;  %v570_v25 = vadd.f32 %v628_v24, %v428_v19 }
 0x2da   :  { %575 = vst [vmem:[#allocation10 + $0x10] sm:$0xff] %v570_v25 }
 0x2db   :  { %898 = shalt.err (!%p895_p8)
}
 0x2dc   :  { %s899_s11 = scalar_lea.hbm %s1058_s7, 384 }
 0x2dd   :  { %p900_p9 = scmp.ne.s32.totalorder %s1058_s7, %s899_s11  ;;  %p903_p10 = scmp.lt.u32.totalorder %s899_s11, %s1058_s7 }
 0x2df   :  { %p905_p11 = pnand %p903_p10, %p900_p9 }
 0x2e1   :  { %908 = shalt.err (!%p905_p11)
}
 0x2e2   :  { %585 = dma.vmem_to_hbm [thread:$0]  %s583_s8, 384, %s1058_s7, [#allocation4]  }
 0x2e3   :  { %915 = dma.done.wait [#allocation4], 384  }
 0x2e4   :  { %916 = vsyncadd [#allocation4], 4294966912 }
 0x2e5   :  { %589 = vsyncpa [#allocation3], 1 }
 0x2e6   :  { %590 = vsyncpa [#allocation6], 1 }
 0x2e7   :  { %591 = vsyncpa [#allocation9], 1 }
 0x2e8   :  { %592 = vsyncpa [#allocation4], 1 }

</bundles_post_ra>
